<compile_context>
chip_gen: v5e
topology: v5e:2x2
jax: 0.10.0
libtpu: 0.0.40
codegen_flags: <defaults>
</compile_context>

<pallas_src>
import jax
import jax.numpy as jnp
from jax.experimental import pallas as pl
from jax.experimental.pallas import tpu as pltpu


def _round_up(x, m):
    return (x + m - 1) // m * m


def _pick_tm(M):
    """Row-tile size.  Large tiles amortize the ~0.35us/grid-step overhead and
    feed HBM/MXU better (~85% of roofline at 512 vs ~63% at 256); for M above
    the thresholds the grid still has >=2 blocks for v7x's two TensorCores."""
    if M >= 1024:
        return 512
    if M >= 512:
        return 256
    if M >= 256:
        return 128
    return _round_up(M, 8)  # single (possibly ragged) block for small graphs


def _make_fused_mlp_kernel(num_layers, compute_dtype):
    """Kernel refs: (x, w0, b0, ..., w_{L-1}, b_{L-1}, emb_out, out)."""

    def kernel(*refs):
        x_ref = refs[0]
        param_refs = refs[1:1 + 2 * num_layers]
        emb_ref = refs[1 + 2 * num_layers]
        out_ref = refs[2 + 2 * num_layers]

        y = x_ref[...]
        # Hidden layers: Linear + ReLU, activations never leave VMEM/vregs.
        for li in range(num_layers - 1):
            w_ref = param_refs[2 * li]
            b_ref = param_refs[2 * li + 1]
            y = jnp.dot(y.astype(compute_dtype), w_ref[...],
                        preferred_element_type=jnp.float32)
            y = jnp.maximum(y + b_ref[...], 0.0)
        emb_ref[...] = y.astype(emb_ref.dtype)

        # Final layer: Linear only.
        w_ref = param_refs[2 * (num_layers - 1)]
        b_ref = param_refs[2 * (num_layers - 1) + 1]
        out = jnp.dot(y.astype(compute_dtype), w_ref[...],
                      preferred_element_type=jnp.float32)
        out_ref[...] = (out + b_ref[...]).astype(out_ref.dtype)

    return kernel


def prepare_mlp_params(params, compute_dtype=jnp.bfloat16):
    """One-time param prep (do NOT redo per forward): pad layer output dims to
    multiples of 128 (lane-dense stores, full-width MXU; zero pad is exact),
    keep the raw input-feature dim unpadded, and cast weights to bf16 for the
    MXU.  Biases stay f32 (added after the f32-accumulated dot)."""
    num_layers = len(params)
    dims = [params[0][0].shape[0]] + [w_t.shape[1] for w_t, _ in params]
    dims_pad = [dims[0]] + [_round_up(d, 128) for d in dims[1:]]
    flat = []
    for li, (w_t, b) in enumerate(params):
        Ki, Ni = w_t.shape
        Kp, Np = dims_pad[li], dims_pad[li + 1]
        w_p = jnp.zeros((Kp, Np), compute_dtype).at[:Ki, :Ni].set(
            w_t.astype(compute_dtype))
        b_p = jnp.zeros((1, Np), jnp.float32).at[0, :Ni].set(
            b.astype(jnp.float32))
        flat.extend([w_p, b_p])
    return tuple(flat), tuple(dims), tuple(dims_pad), compute_dtype


def node_classification_mlp(x, prepared):
    """Mirrors NodeClassificationMLP.forward: returns (embedding, output)."""
    flat_params, dims, dims_pad, compute_dtype = prepared
    num_layers = len(dims) - 1
    M, K0 = x.shape
    assert K0 == dims[0]

    tm = _pick_tm(M)
    grid_m = pl.cdiv(M, tm)

    # --- VMEM budget: weights/biases resident once (Buffered(1)); x/emb/out
    # row tiles double-buffered by the pipeline; plus f32 activation temps. ---
    w_bytes = jnp.dtype(compute_dtype).itemsize
    weight_bytes = sum(
        dims_pad[i] * dims_pad[i + 1] * w_bytes + dims_pad[i + 1] * 4
        for i in range(num_layers))
    tile_bytes = 2 * tm * (dims_pad[0] + dims_pad[-2] + dims_pad[-1]) * 4
    act_bytes = 2 * tm * max(dims_pad) * 4
    vmem_needed = weight_bytes + tile_bytes + act_bytes
    vmem_limit = int(min(64 << 20, max(32 << 20, 2 * vmem_needed)))

    if vmem_needed > (56 << 20):
        # TODO(synk): add a K/N-tiled weight path (extra "arbitrary" grid axis +
        # f32 accumulator scratch) for MLPs whose weights exceed v7x VMEM;
        # fall back to plain XLA so the wrapper never fails outright.
        y = x
        for li in range(num_layers - 1):
            w_p, b_p = flat_params[2 * li], flat_params[2 * li + 1]
            y = jnp.maximum(
                jnp.dot(y.astype(compute_dtype), w_p,
                        preferred_element_type=jnp.float32) + b_p, 0.0)
        emb = y[:, :dims[-2]]
        w_p, b_p = flat_params[-2], flat_params[-1]
        out = jnp.dot(y.astype(compute_dtype), w_p,
                      preferred_element_type=jnp.float32) + b_p
        return emb, out[:, :dims[-1]]

    # x tiled over rows only (ragged last block masked by Pallas); every
    # weight/bias is a single resident VMEM block: constant index_map -> DMA'd
    # once, Buffered(1) -> no wasteful double-buffer copy.
    resident = pl.Buffered(1)
    in_specs = [pl.BlockSpec((tm, dims_pad[0]), lambda i: (i, 0))]
    for li in range(num_layers):
        Kp, Np = dims_pad[li], dims_pad[li + 1]
        in_specs.append(
            pl.BlockSpec((Kp, Np), lambda i: (0, 0), pipeline_mode=resident))
        in_specs.append(
            pl.BlockSpec((1, Np), lambda i: (0, 0), pipeline_mode=resident))

    emb_pad, out_pad = dims_pad[-2], dims_pad[-1]
    out_specs = (
        pl.BlockSpec((tm, emb_pad), lambda i: (i, 0)),
        pl.BlockSpec((tm, out_pad), lambda i: (i, 0)),
    )
    # Note: emb writeback dominates HBM traffic at large M; it could be emitted
    # in bf16 here, but we keep f32 to match the PyTorch module's semantics.
    out_shape = (
        jax.ShapeDtypeStruct((M, emb_pad), x.dtype),
        jax.ShapeDtypeStruct((M, out_pad), x.dtype),
    )

    kernel = _make_fused_mlp_kernel(num_layers, compute_dtype)

    emb_p, out_p = pl.pallas_call(
        kernel,
        out_shape=out_shape,
        grid_spec=pltpu.PrefetchScalarGridSpec(
            num_scalar_prefetch=0,
            grid=(grid_m,),
            in_specs=in_specs,
            out_specs=out_specs,
        ),
        compiler_params=pltpu.CompilerParams(
            dimension_semantics=("parallel",),
            vmem_limit_bytes=vmem_limit,
        ),
    )(x, *flat_params)

    embedding = emb_p[:, :dims[-2]]
    output = out_p[:, :dims[-1]]
    if output.ndim == 1:  # matches `output.unsqueeze(1)` (never hit for 2-D x)
        output = output[:, None]
    return embedding, output


def init_mlp_params(key, layer_dims):
    """Deterministic PyTorch-nn.Linear-style init (uniform +/- 1/sqrt(fan_in))."""
    params = []
    for i in range(len(layer_dims) - 1):
        fan_in, fan_out = layer_dims[i], layer_dims[i + 1]
        key, kw, kb = jax.random.split(key, 3)
        bound = 1.0 / jnp.sqrt(jnp.float32(fan_in))
        # stored pre-transposed: (in_features, out_features)
        w_t = jax.random.uniform(
            kw, (fan_in, fan_out), jnp.float32, minval=-bound, maxval=bound)
        b = jax.random.uniform(
            kb, (fan_out,), jnp.float32, minval=-bound, maxval=bound)
        params.append((w_t, b))
    return params


def reference_mlp(x, params):
    y = x
    for w_t, b in params[:-1]:
        y = jnp.maximum(y @ w_t + b, 0.0)
    emb = y
    w_t, b = params[-1]
    return emb, y @ w_t + b


if __name__ == "__main__":
    key = jax.random.PRNGKey(0)
    key, kx = jax.random.split(key)

    # Small Cora-like setup: 300 nodes, 140 feats -> 256 hidden -> 7 classes.
    # (140 exercises the unpadded-K path, 300 the multi-block ragged row grid.)
    layer_dims = [140, 256, 7]
    num_nodes = 300
    x = jax.random.normal(kx, (num_nodes, layer_dims[0]), dtype=jnp.float32)

    params = init_mlp_params(key, layer_dims)
    prepared = prepare_mlp_params(params)           # pad + bf16-cast ONCE

    embedding, output = node_classification_mlp(x, prepared)
    embedding, output = jax.block_until_ready((embedding, output))

    # sanity check vs pure-JAX f32 reference (bf16 MXU inputs -> loose tol)
    emb_ref, out_ref = reference_mlp(x, params)
    assert embedding.shape == (num_nodes, layer_dims[-2])
    assert output.shape == (num_nodes, layer_dims[-1])
    assert jnp.allclose(embedding, emb_ref, atol=5e-2, rtol=5e-2)
    assert jnp.allclose(output, out_ref, atol=5e-2, rtol=5e-2)

    print("KERNEL_OK")
</pallas_src>

<mosaic_0001>
module attributes {stable_mosaic.version = 11 : i64} {
  func.func @kernel(%arg0: i32, %arg1: memref<128x140xf32, #tpu.memory_space<vmem>>, %arg2: memref<140x256xbf16, #tpu.memory_space<vmem>>, %arg3: memref<1x256xf32, #tpu.memory_space<vmem>>, %arg4: memref<256x128xbf16, #tpu.memory_space<vmem>>, %arg5: memref<1x128xf32, #tpu.memory_space<vmem>>, %arg6: memref<128x256xf32, #tpu.memory_space<vmem>>, %arg7: memref<128x128xf32, #tpu.memory_space<vmem>>) attributes {dimension_semantics = [#tpu.dimension_semantics<parallel>], iteration_bounds = array<i64: 3>, scalar_prefetch = 0 : i64, scratch_operands = 0 : i64, tpu.core_type = #tpu.core_type<tc>, window_params = [{transform_indices = @transform_0, window_bounds = array<i64: 128, 140>}, {pipeline_mode = #tpu.pipeline_mode<synchronous>, transform_indices = @transform_1, window_bounds = array<i64: 140, 256>}, {pipeline_mode = #tpu.pipeline_mode<synchronous>, transform_indices = @transform_2, window_bounds = array<i64: 1, 256>}, {pipeline_mode = #tpu.pipeline_mode<synchronous>, transform_indices = @transform_3, window_bounds = array<i64: 256, 128>}, {pipeline_mode = #tpu.pipeline_mode<synchronous>, transform_indices = @transform_4, window_bounds = array<i64: 1, 128>}, {transform_indices = @transform_5, window_bounds = array<i64: 128, 256>}, {transform_indices = @transform_6, window_bounds = array<i64: 128, 128>}]} {
    %c0 = arith.constant 0 : index
    %c0_0 = arith.constant 0 : index
    %0 = vector.load %arg1[%c0, %c0_0] : memref<128x140xf32, #tpu.memory_space<vmem>>, vector<128x140xf32>
    %1 = arith.truncf %0 : vector<128x140xf32> to vector<128x140xbf16>
    %c0_1 = arith.constant 0 : index
    %c0_2 = arith.constant 0 : index
    %2 = vector.load %arg2[%c0_1, %c0_2] : memref<140x256xbf16, #tpu.memory_space<vmem>>, vector<140x256xbf16>
    %cst = arith.constant dense<0.000000e+00> : vector<128x256xf32>
    %3 = tpu.matmul %1, %2, %cst {dimension_numbers = #tpu.dot_dimension_numbers<[1], [0], [0], [1], [0, 0, 1, 1], [], []>} : vector<128x140xbf16>, vector<140x256xbf16>, vector<128x256xf32> -> vector<128x256xf32>
    %c0_3 = arith.constant 0 : index
    %c0_4 = arith.constant 0 : index
    %4 = vector.load %arg3[%c0_3, %c0_4] : memref<1x256xf32, #tpu.memory_space<vmem>>, vector<1x256xf32>
    %5 = vector.broadcast %4 : vector<1x256xf32> to vector<128x256xf32>
    %6 = arith.addf %3, %5 : vector<128x256xf32>
    %cst_5 = arith.constant 0.000000e+00 : f32
    %7 = vector.broadcast %cst_5 : f32 to vector<128x256xf32>
    %8 = arith.maximumf %6, %7 : vector<128x256xf32>
    %c0_6 = arith.constant 0 : index
    %c0_7 = arith.constant 0 : index
    %9 = vector.load %arg6[%c0_6, %c0_7] : memref<128x256xf32, #tpu.memory_space<vmem>>, vector<128x256xf32>
    tpu.vector_store %arg6[%c0_6, %c0_7], %8 {strides = array<i32>} : memref<128x256xf32, #tpu.memory_space<vmem>>, vector<128x256xf32>,
    %10 = arith.truncf %8 : vector<128x256xf32> to vector<128x256xbf16>
    %c0_8 = arith.constant 0 : index
    %c0_9 = arith.constant 0 : index
    %11 = vector.load %arg4[%c0_8, %c0_9] : memref<256x128xbf16, #tpu.memory_space<vmem>>, vector<256x128xbf16>
    %cst_10 = arith.constant dense<0.000000e+00> : vector<128x128xf32>
    %12 = tpu.matmul %10, %11, %cst_10 {dimension_numbers = #tpu.dot_dimension_numbers<[1], [0], [0], [1], [0, 0, 1, 1], [], []>} : vector<128x256xbf16>, vector<256x128xbf16>, vector<128x128xf32> -> vector<128x128xf32>
    %c0_11 = arith.constant 0 : index
    %c0_12 = arith.constant 0 : index
    %13 = vector.load %arg5[%c0_11, %c0_12] : memref<1x128xf32, #tpu.memory_space<vmem>>, vector<1x128xf32>
    %14 = vector.broadcast %13 : vector<1x128xf32> to vector<128x128xf32>
    %15 = arith.addf %12, %14 : vector<128x128xf32>
    %c0_13 = arith.constant 0 : index
    %c0_14 = arith.constant 0 : index
    %16 = vector.load %arg7[%c0_13, %c0_14] : memref<128x128xf32, #tpu.memory_space<vmem>>, vector<128x128xf32>
    tpu.vector_store %arg7[%c0_13, %c0_14], %15 {strides = array<i32>} : memref<128x128xf32, #tpu.memory_space<vmem>>, vector<128x128xf32>,
    return
  }
  func.func @transform_0(%arg0: i32) -> (i32, i32) {
    %c0_i32 = arith.constant 0 : i32
    %c0_i32_0 = arith.constant 0 : i32
    return %arg0, %c0_i32 : i32, i32
  }
  func.func @transform_1(%arg0: i32) -> (i32, i32) {
    %c0_i32 = arith.constant 0 : i32
    %c0_i32_0 = arith.constant 0 : i32
    %c0_i32_1 = arith.constant 0 : i32
    return %c0_i32, %c0_i32_0 : i32, i32
  }
  func.func @transform_2(%arg0: i32) -> (i32, i32) {
    %c0_i32 = arith.constant 0 : i32
    %c0_i32_0 = arith.constant 0 : i32
    %c0_i32_1 = arith.constant 0 : i32
    return %c0_i32, %c0_i32_0 : i32, i32
  }
  func.func @transform_3(%arg0: i32) -> (i32, i32) {
    %c0_i32 = arith.constant 0 : i32
    %c0_i32_0 = arith.constant 0 : i32
    %c0_i32_1 = arith.constant 0 : i32
    return %c0_i32, %c0_i32_0 : i32, i32
  }
  func.func @transform_4(%arg0: i32) -> (i32, i32) {
    %c0_i32 = arith.constant 0 : i32
    %c0_i32_0 = arith.constant 0 : i32
    %c0_i32_1 = arith.constant 0 : i32
    return %c0_i32, %c0_i32_0 : i32, i32
  }
  func.func @transform_5(%arg0: i32) -> (i32, i32) {
    %c0_i32 = arith.constant 0 : i32
    %c0_i32_0 = arith.constant 0 : i32
    return %arg0, %c0_i32 : i32, i32
  }
  func.func @transform_6(%arg0: i32) -> (i32, i32) {
    %c0_i32 = arith.constant 0 : i32
    %c0_i32_0 = arith.constant 0 : i32
    return %arg0, %c0_i32 : i32, i32
  }
}

</mosaic_0001>

<bundles_post_ra>
// kernel: tpu_custom_call.1
= control target key start
LH: loop header
LB: loop body
LE: loop exit
PB: predicated region body
PF: predicated region fallthrough
CT: control target
= control target key end

     0   :  { %s2146_s0 = inlined_call_operand.vmem [shape: f32[300,140], index: 0, kind: input, shape index: {}]   ;;  %s2147_s1 = inlined_call_operand.vmem [shape: bf16[140,256], index: 1, kind: input, shape index: {}]   ;;  %s2148_s2 = inlined_call_operand.vmem [shape: f32[1,256], index: 2, kind: input, shape index: {}]   ;;  %s2149_s3 = inlined_call_operand.vmem [shape: bf16[256,128], index: 3, kind: input, shape index: {}]   ;;  %s2150_s4 = inlined_call_operand.vmem [shape: f32[1,128], index: 4, kind: input, shape index: {}]   ;;  %s2151_s5 = inlined_call_operand.hbm [shape: f32[300,256], index: 5, kind: output, shape index: {0}]   ;;  %s2152_s6 = inlined_call_operand.hbm [shape: f32[300,128], index: 6, kind: output, shape index: {1}]  }
   0x1   :  { %2155 = sst [smem:[#allocation8_spill]] %s2146_s0 }
   0x2   :  { %2156 = sst [smem:[#allocation9_spill]] %s2147_s1 }
   0x3   :  { %2157 = sst [smem:[#allocation10_spill]] %s2148_s2 }
   0x4   :  { %12 = vsyncpa [#allocation3], 0 }
   0x5   :  { %14 = vsyncpa [#allocation3 + $0x1], 0 }
   0x6   :  { %15 = vsyncpa [#allocation5], 0 }
   0x7   :  { %17 = vsyncpa [#allocation5 + $0x1], 0  ;;  %s1592_s21 = smov 0   ;;  %s1594_s22 = smov 0  }
   0x8   :  { %s1596_s23 = smov 0   ;;  %s1598_s24 = smov 0  }
   0x9 LB: > { %s1613_s25 = sadd.s32 4294967295, %s1549_s24   ;;  %s1166_s26 = sadd.s32 4294967294, %s1549_s24   ;;  %s1549_s24 = sphi %s1598_s24, %s2172_s24   ;;  %s1545_s23 = sphi %s1596_s23, %s2171_s23   ;;  %s1541_s22 = sphi %s1594_s22, %s2170_s22   ;;  %s1537_s21 = sphi %s1592_s21, %s2169_s21  }
   0xa   : > { %s1617_s27 = sadd.s32 1, %s1549_s24   ;;  %s140_s28 = sadd.s32 1, %s1545_s23 }
   0xb   : > { %s137_s29 = ssub.s32 %s1549_s24, %s1617_s27  ;;  %p150_p0 = scmp.ne.s32.totalorder %s1545_s23, %s1541_s22 }
   0xc   : > { %p138_p1 = scmp.eq.s32.totalorder %s137_s29, 0  ;;  %p151_p2 = scmp.eq.s32.totalorder %s1613_s25, 2 }
   0xd   : > { %p156_p3 = scmp.ne.s32.totalorder %s1541_s22, %s1537_s21  ;;  %p157_p4 = scmp.eq.s32.totalorder %s1166_s26, 2 }
   0xe   : > { %s1628_s30 = scalar_select %p138_p1, %s1545_s23, %s140_s28  }
   0xf   : > { %p1630_p5 = por %p151_p2, %p150_p0  ;;  %p1634_p6 = por %p157_p4, %p156_p3 }
  0x10   : > { %p1169_p7 = scmp.ge.s32.totalorder %s1549_s24, 1  ;;  %p233_p8 = scmp.lt.s32.totalorder %s1549_s24, 4 }
  0x12   : > { %p234_p9 = pnand %p1169_p7, %p233_p8 }
  0x13   : > { %s2160_s1 = sld [smem:[#allocation9_spill]] (!%p234_p9)  ;;  %s1695_s15 = sshll.u32 (!%p234_p9), %s1613_s25, 4 }
  0x14   : > { %237 = sbr.rel (%p234_p9) target bundleno = 658 (0x292), region = 40  ;;  %p280_p10 = scmp.lt.s32.totalorder (!%p234_p9), %s1695_s15, 37 }
  0x15   : > { %s2161_s0 = sld [smem:[#allocation8_spill]] (!%p234_p9)  ;;  %s1844_s26 = sand.u32 (!%p234_p9), 1, %s1541_s22  }
  0x16   : > { %s2162_s2 = sld [smem:[#allocation10_spill]] (!%p234_p9)  ;;  %s1171_s16 = sshll.u32 (!%p234_p9), %s1844_s26, 7 }
  0x17   : > { %s2153_s18 = scalar_lea.sflag (!%p234_p9), [#allocation3], %s1844_s26 }
  0x19   : > { %v1233_v0 = vld [vmem:[%s2160_s1 + $0x70] sm:$0xf]  ;;  %v1361_v1 = vld [vmem:[%s2160_s1 + $0x74] sm:$0xf0]  ;;  %v1360_v2 = vld [vmem:[%s2160_s1 + $0x74] sm:$0xf] }
  0x1a   : > { %v1234_v3 = vor.u32 %v1361_v1, %v1233_v0  ;;  %v1235_v4 = vld [vmem:[%s2160_s1 + $0x78] sm:$0xf0]  ;;  %v1225_v5 = vld [vmem:[%s2160_s1 + $0x60] sm:$0xf]  ;;  %v1359_v6 = vld [vmem:[%s2160_s1 + $0x64] sm:$0xf0] }
  0x1b   : > { %v1238_v7 = vor.u32 %v1360_v2, %v1235_v4  ;;  %v1358_v8 = vld [vmem:[%s2160_s1 + $0x64] sm:$0xf]  ;;  %v1227_v9 = vld [vmem:[%s2160_s1 + $0x68] sm:$0xf0]  ;;  %v1226_v10 = vor.u32 %v1359_v6, %v1225_v5  ;;  %v1217_v12 = vld [vmem:[%s2160_s1 + $0x50] sm:$0xf] }
  0x1c   : > { %495 = vmatpush.bf16.msra.mxu0 %v1234_v3  ;;  %v1230_v11 = vor.u32 %v1358_v8, %v1227_v9  ;;  %v1357_v13 = vld [vmem:[%s2160_s1 + $0x54] sm:$0xf0]  ;;  %v1356_v14 = vld [vmem:[%s2160_s1 + $0x54] sm:$0xf]  ;;  %v1219_v15 = vld [vmem:[%s2160_s1 + $0x58] sm:$0xf0] }
  0x1d   : > { %593 = vmatpush.bf16.msra.mxu2 %v1238_v7  ;;  %v1218_v16 = vor.u32 %v1357_v13, %v1217_v12  ;;  %v1222_v17 = vor.u32 %v1356_v14, %v1219_v15  ;;  %v1209_v18 = vld [vmem:[%s2160_s1 + $0x40] sm:$0xf]  ;;  %v1355_v19 = vld [vmem:[%s2160_s1 + $0x44] sm:$0xf0]  ;;  %v1354_v20 = vld [vmem:[%s2160_s1 + $0x44] sm:$0xf] }
  0x1e   : > { %v1211_v21 = vld [vmem:[%s2160_s1 + $0x48] sm:$0xf0]  ;;  %v1201_v22 = vld [vmem:[%s2160_s1 + $0x30] sm:$0xf]  ;;  %v1353_v23 = vld [vmem:[%s2160_s1 + $0x34] sm:$0xf0]  ;;  %v1210_v24 = vor.u32 %v1355_v19, %v1209_v18 }
  0x1f   : > { %v1362_v25 = vld [vmem:[%s2160_s1 + $0x84] sm:$0xf]  ;;  %v1243_v26 = vld [vmem:[%s2160_s1 + $0x88] sm:$0x30]  ;;  %vm488_vm0 = vcmask 1045504   ;;  %v1214_v27 = vor.u32 %v1354_v20, %v1211_v21  ;;  %v1202_v35 = vor.u32 %v1353_v23, %v1201_v22  ;;  %s281_s28 = scalar_select %p280_p10, %s1695_s15, 37 }
  0x20   : > { %496 = vmatpush.bf16.msra.mxu0 %v1226_v10  ;;  %v1246_v28 = vor.u32 %v1362_v25, %v1243_v26  ;;  %v1241_v29 = vld [vmem:[%s2160_s1 + $0x80] sm:$0xf]  ;;  %v1363_v30 = vld [vmem:[%s2160_s1 + $0x84] sm:$0x30]  ;;  %v1352_v31 = vld [vmem:[%s2160_s1 + $0x34] sm:$0xf] }
  0x21   : > { %594 = vmatpush.bf16.msra.mxu2 %v1230_v11  ;;  %v1203_v32 = vld [vmem:[%s2160_s1 + $0x38] sm:$0xf0]  ;;  %v1242_v33 = vor.u32 %v1363_v30, %v1241_v29  ;;  %v1193_v38 = vld [vmem:[%s2160_s1 + $0x20] sm:$0xf]  ;;  %v1351_v39 = vld [vmem:[%s2160_s1 + $0x24] sm:$0xf0] }
  0x22   : > { %v493_v34 = vsel %vm488_vm0, %v1246_v28, 0  ;;  %v1206_v37 = vor.u32 %v1352_v31, %v1203_v32  ;;  %v1350_v40 = vld [vmem:[%s2160_s1 + $0x24] sm:$0xf]  ;;  %v1195_v41 = vld [vmem:[%s2160_s1 + $0x28] sm:$0xf0]  ;;  %v1194_v42 = vor.u32 %v1351_v39, %v1193_v38  ;;  %s1345_s17 = sshll.u32 %s281_s28, 4 }
  0x23   : > { %v490_v36 = vsel %vm488_vm0, %v1242_v33, 0  ;;  %1385 = vmatpush.bf16.msra.mxu3 %v493_v34  ;;  %v1198_v43 = vor.u32 %v1350_v40, %v1195_v41  ;;  %v1185_v44 = vld [vmem:[%s2160_s1 + $0x10] sm:$0xf]  ;;  %v1349_v45 = vld [vmem:[%s2160_s1 + $0x14] sm:$0xf0]  ;;  %s1752_s10 = scalar_lea.vmem %s2161_s0, %s1345_s17  ;;  %vm463_vm1 = vcmask 97280  }
  0x24   : > { %497 = vmatpush.bf16.msra.mxu0 %v1218_v16  ;;  %1384 = vmatpush.bf16.msra.mxu1 %v490_v36  ;;  %v1348_v46 = vld [vmem:[%s2160_s1 + $0x14] sm:$0xf]  ;;  %v1187_v47 = vld [vmem:[%s2160_s1 + $0x18] sm:$0xf0]  ;;  %v1186_v48 = vor.u32 %v1349_v45, %v1185_v44  ;;  %v1177_v50 = vld [vmem:[%s2160_s1] sm:$0xf] }
  0x25   : > { %595 = vmatpush.bf16.msra.mxu2 %v1222_v17  ;;  %v1190_v49 = vor.u32 %v1348_v46, %v1187_v47  ;;  %v1347_v51 = vld [vmem:[%s2160_s1 + $0x4] sm:$0xf0]  ;;  %v1346_v52 = vld [vmem:[%s2160_s1 + $0x4] sm:$0xf]  ;;  %v1179_v53 = vld [vmem:[%s2160_s1 + $0x8] sm:$0xf0] }
  0x26   : > { %v1178_v54 = vor.u32 %v1347_v51, %v1177_v50  ;;  %v303_v55 = vld [vmem:[%s1752_s10] sm:$0xff]  ;;  %v305_v56 = vld [vmem:[%s1752_s10 + $0x10] sm:$0xff]  ;;  %v1182_v57 = vor.u32 %v1346_v52, %v1179_v53  ;;  %v316_v62 = vld [vmem:[%s1752_s10 + $0x68] sm:$0xff]  ;;  %s2006_s17 = scalar_lea.vmem [#allocation4], %s1171_s16  ;;  %s1031_s20 = ssub.s32 (%p1630_p5), 38, %s1695_s15 }
  0x27   : > { %v335_v58 = vpack.c.bf16 %v305_v56, %v303_v55  ;;  %v307_v59 = vld [vmem:[%s1752_s10 + $0x20] sm:$0xff]  ;;  %v309_v60 = vld [vmem:[%s1752_s10 + $0x30] sm:$0xff]  ;;  %v318_v63 = vld [vmem:[%s1752_s10 + $0x78] sm:$0xff]  ;;  %p1032_p11 = scmp.lt.s32.totalorder (%p1630_p5), %s1031_s20, 16 }
  0x28   : > { %498 = vmatpush.bf16.msra.mxu0 %v1210_v24  ;;  %v337_v61 = vpack.c.bf16 %v309_v60, %v307_v59  ;;  %v342_v0 = vpack.c.bf16 %v318_v63, %v316_v62  ;;  %v311_v1 = vld [vmem:[%s1752_s10 + $0x40] sm:$0xff]  ;;  %v313_v2 = vld [vmem:[%s1752_s10 + $0x50] sm:$0xff]  ;;  %v320_v4 = vld [vmem:[%s1752_s10 + $0x88] sm:$0xff] }
  0x29   : > { %596 = vmatpush.bf16.msra.mxu2 %v1214_v27  ;;  %v339_v3 = vpack.c.bf16 %v313_v2, %v311_v1  ;;  %v322_v5 = vld [vmem:[%s1752_s10 + $0x98] sm:$0xff]  ;;  %v315_v7 = vld [vmem:[%s1752_s10 + $0x60] sm:$0xff]  ;;  %v317_v8 = vld [vmem:[%s1752_s10 + $0x70] sm:$0xff] }
  0x2a   : > { %1258 = vmatmul.msk.bf16.vlgmr.msra.gmra.mxu3 %vm463_vm1, %v342_v0  ;;  %1250 = vmatmul.msk.bf16.vlgmr.msra.gmra.mxu1 %vm463_vm1, %v342_v0  ;;  %v344_v6 = vpack.c.bf16 %v322_v5, %v320_v4  ;;  %v341_v9 = vpack.c.bf16 %v317_v8, %v315_v7  ;;  %v324_v10 = vld [vmem:[%s1752_s10 + $0xa8] sm:$0xff]  ;;  %v326_v11 = vld [vmem:[%s1752_s10 + $0xb8] sm:$0xff]  ;;  %v319_v13 = vld [vmem:[%s1752_s10 + $0x80] sm:$0xff] }
  0x2b   : > { %v346_v12 = vpack.c.bf16 %v326_v11, %v324_v10  ;;  %v321_v14 = vld [vmem:[%s1752_s10 + $0x90] sm:$0xff]  ;;  %v328_v16 = vld [vmem:[%s1752_s10 + $0xc8] sm:$0xff]  ;;  %v330_v17 = vld [vmem:[%s1752_s10 + $0xd8] sm:$0xff] }
  0x2c   : > { %499 = vmatpush.bf16.msra.mxu0 %v1202_v35  ;;  %v343_v15 = vpack.c.bf16 %v321_v14, %v319_v13  ;;  %v348_v18 = vpack.c.bf16 %v330_v17, %v328_v16  ;;  %v323_v19 = vld [vmem:[%s1752_s10 + $0xa0] sm:$0xff]  ;;  %v325_v20 = vld [vmem:[%s1752_s10 + $0xb0] sm:$0xff]  ;;  %v332_v22 = vld [vmem:[%s1752_s10 + $0xe8] sm:$0xff] }
  0x2d   : > { %597 = vmatpush.bf16.msra.mxu2 %v1206_v37  ;;  %v345_v21 = vpack.c.bf16 %v325_v20, %v323_v19  ;;  %v334_v23 = vld [vmem:[%s1752_s10 + $0xf8] sm:$0xff]  ;;  %v327_v25 = vld [vmem:[%s1752_s10 + $0xc0] sm:$0xff]  ;;  %v329_v26 = vld [vmem:[%s1752_s10 + $0xd0] sm:$0xff] }
  0x2e   : > { %v350_v24 = vpack.c.bf16 %v334_v23, %v332_v22  ;;  %v347_v27 = vpack.c.bf16 %v329_v26, %v327_v25  ;;  %v331_v28 = vld [vmem:[%s1752_s10 + $0xe0] sm:$0xff]  ;;  %v333_v29 = vld [vmem:[%s1752_s10 + $0xf0] sm:$0xff]  ;;  %v304_v31 = vld [vmem:[%s1752_s10 + $0x8] sm:$0xff] }
  0x2f   : > { %v349_v30 = vpack.c.bf16 %v333_v29, %v331_v28  ;;  %v306_v32 = vld [vmem:[%s1752_s10 + $0x18] sm:$0xff]  ;;  %v308_v37 = vld [vmem:[%s1752_s10 + $0x28] sm:$0xff]  ;;  %v369_v55 = vld [vmem:[%s2162_s2] sm:$0x3] }
  0x30   : > { %500 = vmatpush.bf16.msra.mxu0 %v1194_v42  ;;  %v336_v33 = vpack.c.bf16 %v306_v32, %v304_v31  ;;  %v310_v38 = vld [vmem:[%s1752_s10 + $0x38] sm:$0xff]  ;;  %v312_v44 = vld [vmem:[%s1752_s10 + $0x48] sm:$0xff]  ;;  %v1851_v2 = vperm.slane %v369_v55, 1  ;;  %v1368_v32 = vld [vmem:[%s2149_s3 + $0x20] sm:$0xff] }
  0x31   : > { %598 = vmatpush.bf16.msra.mxu2 %v1198_v43  ;;  %v338_v40 = vpack.c.bf16 %v310_v38, %v308_v37  ;;  %v314_v45 = vld [vmem:[%s1752_s10 + $0x58] sm:$0xff]  ;;  %s1170_s10 = sshll.u32 %s1844_s26, 8  ;;  %v1377_v14 = vld [vmem:[%s2149_s3 + $0x68] sm:$0xff] }
  0x32   : > { %v1379_v52 = vld [vmem:[%s2149_s3 + $0x78] sm:$0xff]  ;;  %s1856_s28 = scalar_lea.vmem [#allocation2], %s1170_s10  ;;  %v1369_v16 = vld [vmem:[%s2149_s3 + $0x28] sm:$0xff] }
  0x33   : > { %952 = vmatpush.bf16.msrb.mxu3 %v1379_v52  ;;  %v1371_v56 = vld [vmem:[%s2149_s3 + $0x38] sm:$0xff] }
  0x34   : > { %501 = vmatpush.bf16.msra.mxu0 %v1186_v48  ;;  %v340_v48 = vpack.c.bf16 %v314_v45, %v312_v44  ;;  %903 = vmatpush.bf16.msrb.mxu1 %v1371_v56 }
  0x35   : > { %599 = vmatpush.bf16.msra.mxu2 %v1190_v49 }
  0x38   : > { %502 = vmatpush.bf16.msra.mxu0 %v1178_v54 }
  0x39   : > { %600 = vmatpush.bf16.msra.mxu2 %v1182_v57  ;;  %v1839_v57 = vperm.slane %v369_v55, 0 }
  0x3a   : > { %1259 = vmatmul.msk.bf16.gmra.mxu3 %vm463_vm1, %v344_v6  ;;  %1251 = vmatmul.msk.bf16.gmra.mxu1 %vm463_vm1, %v344_v6 }
  0x3b   : > { %503 = vmatmul.bf16.vlgmr.msra.gmra.mxu0 %v335_v58 }
  0x3c   : > { %551 = vmatpush.bf16.msrb.mxu0 %v490_v36  ;;  %601 = vmatmul.bf16.vlgmr.msra.gmra.mxu2 %v335_v58 }
  0x3d   : > { %649 = vmatpush.bf16.msrb.mxu2 %v493_v34 }
  0x4a   : > { %1260 = vmatmul.msk.bf16.gmra.mxu3 %vm463_vm1, %v346_v12  ;;  %1252 = vmatmul.msk.bf16.gmra.mxu1 %vm463_vm1, %v346_v12 }
  0x4b   : > { %508 = vmatmul.bf16.gmra.mxu0 %v337_v61 }
  0x4c   : > { %606 = vmatmul.bf16.gmra.mxu2 %v337_v61  ;;  %v1378_v61 = vld [vmem:[%s2149_s3 + $0x70] sm:$0xff] }
  0x4d   : > { %953 = vmatpush.bf16.msrb.mxu3 %v1378_v61 }
  0x51   : > { %954 = vmatpush.bf16.msrb.mxu3 %v1377_v14 }
  0x5a   : > { %1261 = vmatmul.msk.bf16.gmra.mxu3 %vm463_vm1, %v348_v18  ;;  %1253 = vmatmul.msk.bf16.gmra.mxu1 %vm463_vm1, %v348_v18 }
  0x5b   : > { %513 = vmatmul.bf16.gmra.mxu0 %v339_v3 }
  0x5c   : > { %611 = vmatmul.bf16.gmra.mxu2 %v339_v3  ;;  %v1370_v3 = vld [vmem:[%s2149_s3 + $0x30] sm:$0xff] }
  0x5d   : > { %904 = vmatpush.bf16.msrb.mxu1 %v1370_v3 }
  0x61   : > { %905 = vmatpush.bf16.msrb.mxu1 %v1369_v16 }
  0x65   : > { %906 = vmatpush.bf16.msrb.mxu1 %v1368_v32 }
  0x6a   : > { %1262 = vmatmul.msk.bf16.gmra.mxu3 %vm463_vm1, %v350_v24  ;;  %1254 = vmatmul.msk.bf16.gmra.mxu1 %vm463_vm1, %v350_v24 }
  0x6b   : > { %518 = vmatmul.bf16.gmra.mxu0 %v341_v9 }
  0x6c   : > { %616 = vmatmul.bf16.gmra.mxu2 %v341_v9 }
  0x7b   : > { %523 = vmatmul.bf16.gmra.mxu0 %v343_v15 }
  0x7c   : > { %621 = vmatmul.bf16.gmra.mxu2 %v343_v15 }
  0x8b   : > { %528 = vmatmul.bf16.gmra.mxu0 %v345_v21 }
  0x8c   : > { %626 = vmatmul.bf16.gmra.mxu2 %v345_v21 }
  0x9b   : > { %533 = vmatmul.bf16.gmra.mxu0 %v347_v27 }
  0x9c   : > { %631 = vmatmul.bf16.gmra.mxu2 %v347_v27  ;;  %v1376_v27 = vld [vmem:[%s2149_s3 + $0x60] sm:$0xff] }
  0x9d   : > { %955 = vmatpush.bf16.msrb.mxu3 %v1376_v27  ;;  %v1365_v27 = vld [vmem:[%s2149_s3 + $0x8] sm:$0xff] }
  0xa7   : > { %v568_v46 = vpop.f32.mrf.mxu1 }
  0xab   : > { %538 = vmatmul.bf16.gmra.mxu0 %v349_v30 }
  0xac   : > { %636 = vmatmul.bf16.gmra.mxu2 %v349_v30 }
  0xad   : > { %v666_v50 = vpop.f32.mrf.mxu3 }
  0xaf   : > { %v570_v54 = vpop.f32.mrf.mxu1 }
  0xb5   : > { %v668_v59 = vpop.f32.mrf.mxu3 }
  0xb7   : > { %v573_v63 = vpop.f32.mrf.mxu1 }
  0xb8   : > { %v1798_v34 = vpop.f32.mrf.mxu0 }
  0xbb   : > { %1247 = vmatmul.msk.bf16.vlgmr.msrb.gmra.mxu0 %vm463_vm1, %v336_v33 }
  0xbc   : > { %1255 = vmatmul.msk.bf16.vlgmr.msrb.gmra.mxu2 %vm463_vm1, %v336_v33 }
  0xbd   : > { %v671_v8 = vpop.f32.mrf.mxu3 }
  0xbf   : > { %v1802_v35 = vpop.f32.mrf.mxu2  ;;  %v575_v12 = vpop.f32.mrf.mxu1 }
  0xc0   : > { %v1804_v36 = vpop.f32.mrf.mxu0 }
  0xc5   : > { %v673_v23 = vpop.f32.mrf.mxu3 }
  0xc7   : > { %v1808_v39 = vpop.f32.mrf.mxu2  ;;  %v578_v26 = vpop.f32.mrf.mxu1 }
  0xc8   : > { %v1810_v41 = vpop.f32.mrf.mxu0 }
  0xcb   : > { %1248 = vmatmul.msk.bf16.gmra.mxu0 %vm463_vm1, %v338_v40 }
  0xcc   : > { %1256 = vmatmul.msk.bf16.gmra.mxu2 %vm463_vm1, %v338_v40 }
  0xcd   : > { %v676_v45 = vpop.f32.mrf.mxu3 }
  0xcf   : > { %v1814_v42 = vpop.f32.mrf.mxu2  ;;  %v580_v55 = vpop.f32.mrf.mxu1 }
  0xd0   : > { %v1816_v43 = vpop.f32.mrf.mxu0 }
  0xd5   : > { %v678_v3 = vpop.f32.mrf.mxu3 }
  0xd7   : > { %v1820_v47 = vpop.f32.mrf.mxu2 }
  0xd8   : > { %v1822_v49 = vpop.f32.mrf.mxu0 }
  0xdb   : > { %1249 = vmatmul.msk.bf16.gmra.mxu0 %vm463_vm1, %v340_v48 }
  0xdc   : > { %1257 = vmatmul.msk.bf16.gmra.mxu2 %vm463_vm1, %v340_v48  ;;  %v1375_v48 = vld [vmem:[%s2149_s3 + $0x58] sm:$0xff] }
  0xdd   : > { %956 = vmatpush.bf16.msrb.mxu3 %v1375_v48  ;;  %v1372_v48 = vld [vmem:[%s2149_s3 + $0x40] sm:$0xff] }
  0xdf   : > { %v1826_v51 = vpop.f32.mrf.mxu2 }
  0xe0   : > { %v1831_v53 = vpop.f32.mrf.mxu0 }
  0xe7   : > { %v1841_v58 = vpop.f32.mrf.mxu2 }
  0xe8   : > { %v519_v60 = vpop.f32.mrf.mxu0 }
  0xe9   : > { %v520_v62 = vadd.f32 %v519_v60, %v1839_v57 }
  0xeb   : > { %v569_v0 = vadd.f32 %v568_v46, %v520_v62 }
  0xed   : > { %v703_v1 = vmax.f32 %v569_v0, 0.0 }
  0xef   : > { %735 = vst [vmem:[%s1856_s28 + $0x60] sm:$0xff] %v703_v1  ;;  %v617_v4 = vpop.f32.mrf.mxu2 }
  0xf0   : > { %v618_v5 = vadd.f32 %v617_v4, %v1851_v2  ;;  %v521_v6 = vpop.f32.mrf.mxu0 }
  0xf1   : > { %v522_v7 = vadd.f32 %v521_v6, %v1839_v57  ;;  %v1374_v6 = vld [vmem:[%s2149_s3 + $0x50] sm:$0xff] }
  0xf2   : > { %v667_v9 = vadd.f32 %v666_v50, %v618_v5  ;;  %957 = vmatpush.bf16.msrb.mxu3 %v1374_v6 }
  0xf3   : > { %v571_v10 = vadd.f32 %v570_v54, %v522_v7 }
  0xf4   : > { %v704_v11 = vmax.f32 %v667_v9, 0.0  ;;  %v583_v9 = vpop.f32.mrf.mxu1 }
  0xf5   : > { %v705_v13 = vmax.f32 %v571_v10, 0.0 }
  0xf6   : > { %736 = vst [vmem:[%s1856_s28 + $0x68] sm:$0xff] %v704_v11 }
  0xf7   : > { %737 = vst [vmem:[%s1856_s28 + $0x70] sm:$0xff] %v705_v13  ;;  %v619_v15 = vpop.f32.mrf.mxu2  ;;  %v1869_v17 = vpack.c.bf16 %v705_v13, %v703_v1  ;;  %v1366_v13 = vld [vmem:[%s2149_s3 + $0x10] sm:$0xff] }
  0xf8   : > { %v620_v18 = vadd.f32 %v619_v15, %v1851_v2  ;;  %v524_v19 = vpop.f32.mrf.mxu0 }
  0xf9   : > { %v525_v20 = vadd.f32 %v524_v19, %v1839_v57 }
  0xfa   : > { %v669_v21 = vadd.f32 %v668_v59, %v620_v18 }
  0xfb   : > { %v574_v22 = vadd.f32 %v573_v63, %v525_v20  ;;  %v1367_v63 = vld [vmem:[%s2149_s3 + $0x18] sm:$0xff]  ;;  %v681_v20 = vpop.f32.mrf.mxu3 }
  0xfc   : > { %v706_v24 = vmax.f32 %v669_v21, 0.0  ;;  %907 = vmatpush.bf16.msrb.mxu1 %v1367_v63 }
  0xfd   : > { %v707_v25 = vmax.f32 %v574_v22, 0.0 }
  0xfe   : > { %738 = vst [vmem:[%s1856_s28 + $0x78] sm:$0xff] %v706_v24  ;;  %v1877_v28 = vpack.c.bf16 %v706_v24, %v704_v11  ;;  %v585_v24 = vpop.f32.mrf.mxu1 }
  0xff   : > { %739 = vst [vmem:[%s1856_s28 + $0x80] sm:$0xff] %v707_v25  ;;  %v622_v29 = vpop.f32.mrf.mxu2 }
 0x100   : > { %v623_v30 = vadd.f32 %v622_v29, %v1851_v2  ;;  %v526_v31 = vpop.f32.mrf.mxu0  ;;  %908 = vmatpush.bf16.msrb.mxu1 %v1366_v13 }
 0x101   : > { %v527_v33 = vadd.f32 %v526_v31, %v1839_v57 }
 0x102   : > { %v672_v37 = vadd.f32 %v671_v8, %v623_v30 }
 0x103   : > { %v576_v38 = vadd.f32 %v575_v12, %v527_v33 }
 0x104   : > { %v708_v40 = vmax.f32 %v672_v37, 0.0  ;;  %909 = vmatpush.bf16.msrb.mxu1 %v1365_v27  ;;  %v507_v27 = vadd.f32 %v1804_v36, %v1839_v57 }
 0x105   : > { %v709_v44 = vmax.f32 %v576_v38, 0.0 }
 0x106   : > { %740 = vst [vmem:[%s1856_s28 + $0x88] sm:$0xff] %v708_v40 }
 0x107   : > { %741 = vst [vmem:[%s1856_s28 + $0x90] sm:$0xff] %v709_v44  ;;  %v624_v46 = vpop.f32.mrf.mxu2  ;;  %v1890_v50 = vpack.c.bf16 %v709_v44, %v707_v25  ;;  %v1364_v44 = vld [vmem:[%s2149_s3] sm:$0xff] }
 0x108   : > { %v625_v52 = vadd.f32 %v624_v46, %v1851_v2  ;;  %v529_v54 = vpop.f32.mrf.mxu0  ;;  %910 = vmatpush.bf16.msrb.mxu1 %v1364_v44  ;;  %v510_v44 = vadd.f32 %v1810_v41, %v1839_v57 }
 0x109   : > { %v530_v56 = vadd.f32 %v529_v54, %v1839_v57 }
 0x10a   : > { %v674_v59 = vadd.f32 %v673_v23, %v625_v52  ;;  %v588_v52 = vpop.f32.mrf.mxu1 }
 0x10b   : > { %v579_v60 = vadd.f32 %v578_v26, %v530_v56  ;;  %v1373_v26 = vld [vmem:[%s2149_s3 + $0x48] sm:$0xff] }
 0x10c   : > { %v710_v61 = vmax.f32 %v674_v59, 0.0  ;;  %958 = vmatpush.bf16.msrb.mxu3 %v1373_v26  ;;  %v603_v26 = vadd.f32 %v1802_v35, %v1851_v2  ;;  %v605_v35 = vadd.f32 %v1808_v39, %v1851_v2  ;;  %v512_v39 = vadd.f32 %v1816_v43, %v1839_v57 }
 0x10d   : > { %v711_v62 = vmax.f32 %v579_v60, 0.0 }
 0x10e   : > { %742 = vst [vmem:[%s1856_s28 + $0x98] sm:$0xff] %v710_v61  ;;  %v1898_v0 = vpack.c.bf16 %v710_v61, %v708_v40  ;;  %v683_v40 = vpop.f32.mrf.mxu3 }
 0x10f   : > { %743 = vst [vmem:[%s1856_s28 + $0xa0] sm:$0xff] %v711_v62  ;;  %v627_v1 = vpop.f32.mrf.mxu2 }
 0x110   : > { %v628_v4 = vadd.f32 %v627_v1, %v1851_v2  ;;  %v531_v5 = vpop.f32.mrf.mxu0  ;;  %959 = vmatpush.bf16.msrb.mxu3 %v1372_v48 }
 0x111   : > { %v532_v7 = vadd.f32 %v531_v5, %v1839_v57 }
 0x112   : > { %v677_v8 = vadd.f32 %v676_v45, %v628_v4 }
 0x113   : > { %v581_v10 = vadd.f32 %v580_v55, %v532_v7 }
 0x114   : > { %v712_v11 = vmax.f32 %v677_v8, 0.0  ;;  %v590_v8 = vpop.f32.mrf.mxu1 }
 0x115   : > { %v713_v12 = vmax.f32 %v581_v10, 0.0 }
 0x116   : > { %744 = vst [vmem:[%s1856_s28 + $0xa8] sm:$0xff] %v712_v11 }
 0x117   : > { %745 = vst [vmem:[%s1856_s28 + $0xb0] sm:$0xff] %v713_v12  ;;  %v629_v14 = vpop.f32.mrf.mxu2  ;;  %v1911_v15 = vpack.c.bf16 %v713_v12, %v711_v62 }
 0x118   : > { %v630_v16 = vadd.f32 %v629_v14, %v1851_v2  ;;  %v534_v18 = vpop.f32.mrf.mxu0  ;;  %v505_v14 = vadd.f32 %v1798_v34, %v1839_v57 }
 0x119   : > { %v535_v19 = vadd.f32 %v534_v18, %v1839_v57 }
 0x11a   : > { %v679_v21 = vadd.f32 %v678_v3, %v630_v16  ;;  %v686_v3 = vpop.f32.mrf.mxu3 }
 0x11b   : > { %v584_v22 = vadd.f32 %v583_v9, %v535_v19 }
 0x11c   : > { %v714_v23 = vmax.f32 %v679_v21, 0.0 }
 0x11d   : > { %v715_v25 = vmax.f32 %v584_v22, 0.0 }
 0x11e   : > { %746 = vst [vmem:[%s1856_s28 + $0xb8] sm:$0xff] %v714_v23  ;;  %v1922_v29 = vpack.c.bf16 %v714_v23, %v712_v11 }
 0x11f   : > { %747 = vst [vmem:[%s1856_s28 + $0xc0] sm:$0xff] %v715_v25  ;;  %v632_v30 = vpop.f32.mrf.mxu2 }
 0x120   : > { %v633_v31 = vadd.f32 %v632_v30, %v1851_v2  ;;  %v536_v32 = vpop.f32.mrf.mxu0 }
 0x121   : > { %v537_v33 = vadd.f32 %v536_v32, %v1839_v57 }
 0x122   : > { %v682_v37 = vadd.f32 %v681_v20, %v633_v31  ;;  %v688_v19 = vpop.f32.mrf.mxu3 }
 0x123   : > { %v586_v38 = vadd.f32 %v585_v24, %v537_v33 }
 0x124   : > { %v716_v45 = vmax.f32 %v682_v37, 0.0 }
 0x125   : > { %v717_v46 = vmax.f32 %v586_v38, 0.0 }
 0x126   : > { %748 = vst [vmem:[%s1856_s28 + $0xc8] sm:$0xff] %v716_v45 }
 0x127   : > { %749 = vst [vmem:[%s1856_s28 + $0xd0] sm:$0xff] %v717_v46  ;;  %v634_v54 = vpop.f32.mrf.mxu2  ;;  %v1935_v55 = vpack.c.bf16 %v717_v46, %v715_v25 }
 0x128   : > { %v635_v56 = vadd.f32 %v634_v54, %v1851_v2  ;;  %v539_v59 = vpop.f32.mrf.mxu0 }
 0x129   : > { %v540_v60 = vadd.f32 %v539_v59, %v1839_v57  ;;  %v608_v59 = vadd.f32 %v1814_v42, %v1851_v2  ;;  %v515_v42 = vadd.f32 %v1822_v49, %v1839_v57 }
 0x12a   : > { %v684_v61 = vadd.f32 %v683_v40, %v635_v56 }
 0x12b   : > { %v589_v62 = vadd.f32 %v588_v52, %v540_v60 }
 0x12c   : > { %v718_v63 = vmax.f32 %v684_v61, 0.0 }
 0x12d   : > { %v719_v1 = vmax.f32 %v589_v62, 0.0 }
 0x12e   : > { %750 = vst [vmem:[%s1856_s28 + $0xd8] sm:$0xff] %v718_v63  ;;  %v1940_v4 = vpack.c.bf16 %v718_v63, %v716_v45 }
 0x12f   : > { %751 = vst [vmem:[%s1856_s28 + $0xe0] sm:$0xff] %v719_v1  ;;  %v637_v5 = vpop.f32.mrf.mxu2 }
 0x130   : > { %v638_v6 = vadd.f32 %v637_v5, %v1851_v2  ;;  %v541_v7 = vpop.f32.mrf.mxu0  ;;  %v610_v5 = vadd.f32 %v1820_v47, %v1851_v2  ;;  %v517_v47 = vadd.f32 %v1831_v53, %v1839_v57 }
 0x131   : > { %v542_v9 = vadd.f32 %v541_v7, %v1839_v57  ;;  %v2002_v57 = vld [vmem:[%s2150_s4] ss:$0 sm:$0xff] }
 0x132   : > { %v687_v10 = vadd.f32 %v686_v3, %v638_v6 }
 0x133   : > { %v591_v11 = vadd.f32 %v590_v8, %v542_v9 }
 0x134   : > { %v720_v12 = vmax.f32 %v687_v10, 0.0 }
 0x135   : > { %v721_v13 = vmax.f32 %v591_v11, 0.0 }
 0x136   : > { %752 = vst [vmem:[%s1856_s28 + $0xe8] sm:$0xff] %v720_v12 }
 0x137   : > { %753 = vst [vmem:[%s1856_s28 + $0xf0] sm:$0xff] %v721_v13  ;;  %v1949_v16 = vpack.c.bf16 %v721_v13, %v719_v1  ;;  %v639_v18 = vpop.f32.mrf.mxu2 }
 0x138   : > { %v640_v20 = vadd.f32 %v639_v18, %v1851_v2  ;;  %v553_v21 = vpop.f32.mrf.mxu0 }
 0x139   : > { %v554_v22 = vadd.f32 %v553_v21, %v505_v14 }
 0x13a   : > { %v689_v23 = vadd.f32 %v688_v19, %v640_v20 }
 0x13b   : > { %v691_v24 = vmax.f32 %v554_v22, 0.0  ;;  %v615_v22 = vadd.f32 %v1841_v58, %v1851_v2 }
 0x13c   : > { %v722_v25 = vmax.f32 %v689_v23, 0.0 }
 0x13d   : > { %723 = vst [vmem:[%s1856_s28] sm:$0xff] %v691_v24 }
 0x13e   : > { %754 = vst [vmem:[%s1856_s28 + $0xf8] sm:$0xff] %v722_v25  ;;  %v1956_v34 = vpack.c.bf16 %v722_v25, %v720_v12  ;;  %v613_v12 = vadd.f32 %v1826_v51, %v1851_v2 }
 0x13f   : > { %v651_v30 = vpop.f32.mrf.mxu2 }
 0x140   : > { %v652_v31 = vadd.f32 %v651_v30, %v603_v26  ;;  %v555_v32 = vpop.f32.mrf.mxu0 }
 0x141   : > { %v556_v33 = vadd.f32 %v555_v32, %v507_v27 }
 0x142   : > { %v692_v37 = vmax.f32 %v652_v31, 0.0 }
 0x143   : > { %v693_v38 = vmax.f32 %v556_v33, 0.0 }
 0x144   : > { %724 = vst [vmem:[%s1856_s28 + $0x8] sm:$0xff] %v692_v37 }
 0x145   : > { %725 = vst [vmem:[%s1856_s28 + $0x10] sm:$0xff] %v693_v38  ;;  %v755_v40 = vpack.c.bf16 %v693_v38, %v691_v24 }
 0x147   : > { %v653_v45 = vpop.f32.mrf.mxu2  ;;  %911 = vmatmul.bf16.vlgmr.msrb.gmra.mxu1 %v755_v40 }
 0x148   : > { %v654_v36 = vadd.f32 %v653_v45, %v605_v35  ;;  %v558_v46 = vpop.f32.mrf.mxu0 }
 0x149   : > { %v559_v48 = vadd.f32 %v558_v46, %v510_v44 }
 0x14a   : > { %v694_v52 = vmax.f32 %v654_v36, 0.0 }
 0x14b   : > { %v695_v54 = vmax.f32 %v559_v48, 0.0 }
 0x14c   : > { %726 = vst [vmem:[%s1856_s28 + $0x18] sm:$0xff] %v694_v52  ;;  %v756_v56 = vpack.c.bf16 %v694_v52, %v692_v37 }
 0x14d   : > { %727 = vst [vmem:[%s1856_s28 + $0x20] sm:$0xff] %v695_v54 }
 0x14e   : > { %960 = vmatmul.bf16.vlgmr.msrb.gmra.mxu3 %v756_v56 }
 0x14f   : > { %v656_v41 = vpop.f32.mrf.mxu2 }
 0x150   : > { %v657_v60 = vadd.f32 %v656_v41, %v608_v59  ;;  %v560_v61 = vpop.f32.mrf.mxu0 }
 0x151   : > { %v561_v62 = vadd.f32 %v560_v61, %v512_v39 }
 0x152   : > { %v696_v63 = vmax.f32 %v657_v60, 0.0 }
 0x153   : > { %v697_v1 = vmax.f32 %v561_v62, 0.0 }
 0x154   : > { %728 = vst [vmem:[%s1856_s28 + $0x28] sm:$0xff] %v696_v63 }
 0x155   : > { %729 = vst [vmem:[%s1856_s28 + $0x30] sm:$0xff] %v697_v1  ;;  %v757_v3 = vpack.c.bf16 %v697_v1, %v695_v54 }
 0x157   : > { %v658_v6 = vpop.f32.mrf.mxu2  ;;  %916 = vmatmul.bf16.gmra.mxu1 %v757_v3 }
 0x158   : > { %v659_v43 = vadd.f32 %v658_v6, %v610_v5  ;;  %v563_v7 = vpop.f32.mrf.mxu0 }
 0x159   : > { %v564_v8 = vadd.f32 %v563_v7, %v515_v42 }
 0x15a   : > { %v698_v9 = vmax.f32 %v659_v43, 0.0 }
 0x15b   : > { %v699_v10 = vmax.f32 %v564_v8, 0.0 }
 0x15c   : > { %730 = vst [vmem:[%s1856_s28 + $0x38] sm:$0xff] %v698_v9  ;;  %v758_v11 = vpack.c.bf16 %v698_v9, %v696_v63 }
 0x15d   : > { %731 = vst [vmem:[%s1856_s28 + $0x40] sm:$0xff] %v699_v10 }
 0x15e   : > { %965 = vmatmul.bf16.gmra.mxu3 %v758_v11 }
 0x15f   : > { %v661_v49 = vpop.f32.mrf.mxu2 }
 0x160   : > { %v662_v13 = vadd.f32 %v661_v49, %v613_v12  ;;  %v565_v14 = vpop.f32.mrf.mxu0 }
 0x161   : > { %v566_v18 = vadd.f32 %v565_v14, %v517_v47 }
 0x162   : > { %v700_v19 = vmax.f32 %v662_v13, 0.0 }
 0x163   : > { %v701_v20 = vmax.f32 %v566_v18, 0.0 }
 0x164   : > { %732 = vst [vmem:[%s1856_s28 + $0x48] sm:$0xff] %v700_v19 }
 0x165   : > { %733 = vst [vmem:[%s1856_s28 + $0x50] sm:$0xff] %v701_v20  ;;  %v759_v21 = vpack.c.bf16 %v701_v20, %v699_v10 }
 0x167   : > { %v663_v23 = vpop.f32.mrf.mxu2  ;;  %921 = vmatmul.bf16.gmra.mxu1 %v759_v21 }
 0x168   : > { %v664_v51 = vadd.f32 %v663_v23, %v615_v22 }
 0x16a   : > { %v702_v24 = vmax.f32 %v664_v51, 0.0 }
 0x16c   : > { %734 = vst [vmem:[%s1856_s28 + $0x58] sm:$0xff] %v702_v24  ;;  %v760_v25 = vpack.c.bf16 %v702_v24, %v700_v19 }
 0x16e   : > { %970 = vmatmul.bf16.gmra.mxu3 %v760_v25 }
 0x177   : > { %926 = vmatmul.bf16.gmra.mxu1 %v1869_v17 }
 0x17e   : > { %975 = vmatmul.bf16.gmra.mxu3 %v1877_v28 }
 0x187   : > { %931 = vmatmul.bf16.gmra.mxu1 %v1890_v50 }
 0x18e   : > { %980 = vmatmul.bf16.gmra.mxu3 %v1898_v0 }
 0x197   : > { %936 = vmatmul.bf16.gmra.mxu1 %v1911_v15 }
 0x19e   : > { %985 = vmatmul.bf16.gmra.mxu3 %v1922_v29 }
 0x1a7   : > { %941 = vmatmul.bf16.gmra.mxu1 %v1935_v55 }
 0x1ae   : > { %990 = vmatmul.bf16.gmra.mxu3 %v1940_v4 }
 0x1b7   : > { %946 = vmatmul.bf16.gmra.mxu1 %v1949_v16 }
 0x1be   : > { %995 = vmatmul.bf16.gmra.mxu3 %v1956_v34 }
 0x1c4   : > { %v912_v53 = vpop.f32.mrf.mxu1 }
 0x1c5   : > { %v913_v2 = vadd.f32 %v2002_v57, %v912_v53 }
 0x1cc   : > { %v914_v58 = vpop.f32.mrf.mxu1 }
 0x1cd   : > { %v915_v0 = vadd.f32 %v2002_v57, %v914_v58 }
 0x1d1   : > { %v961_v17 = vpop.f32.mrf.mxu3 }
 0x1d2   : > { %v962_v28 = vadd.f32 %v961_v17, %v913_v2 }
 0x1d4   : > { %1001 = vst [vmem:[%s2006_s17] sm:$0xff] %v962_v28  ;;  %v917_v50 = vpop.f32.mrf.mxu1 }
 0x1d5   : > { %v918_v4 = vadd.f32 %v2002_v57, %v917_v50 }
 0x1d9   : > { %v963_v15 = vpop.f32.mrf.mxu3 }
 0x1da   : > { %v964_v29 = vadd.f32 %v963_v15, %v915_v0 }
 0x1dc   : > { %1002 = vst [vmem:[%s2006_s17 + $0x8] sm:$0xff] %v964_v29  ;;  %v919_v55 = vpop.f32.mrf.mxu1 }
 0x1dd   : > { %v920_v27 = vadd.f32 %v2002_v57, %v919_v55 }
 0x1e1   : > { %v966_v16 = vpop.f32.mrf.mxu3 }
 0x1e2   : > { %v967_v26 = vadd.f32 %v966_v16, %v918_v4 }
 0x1e4   : > { %1003 = vst [vmem:[%s2006_s17 + $0x10] sm:$0xff] %v967_v26  ;;  %v922_v34 = vpop.f32.mrf.mxu1 }
 0x1e5   : > { %v923_v33 = vadd.f32 %v2002_v57, %v922_v34 }
 0x1e9   : > { %v968_v30 = vpop.f32.mrf.mxu3 }
 0x1ea   : > { %v969_v31 = vadd.f32 %v968_v30, %v920_v27 }
 0x1ec   : > { %1004 = vst [vmem:[%s2006_s17 + $0x18] sm:$0xff] %v969_v31  ;;  %v924_v32 = vpop.f32.mrf.mxu1 }
 0x1ed   : > { %v925_v35 = vadd.f32 %v2002_v57, %v924_v32 }
 0x1f1   : > { %v971_v37 = vpop.f32.mrf.mxu3 }
 0x1f2   : > { %v972_v38 = vadd.f32 %v971_v37, %v923_v33 }
 0x1f4   : > { %1005 = vst [vmem:[%s2006_s17 + $0x20] sm:$0xff] %v972_v38  ;;  %v927_v40 = vpop.f32.mrf.mxu1 }
 0x1f5   : > { %v928_v46 = vadd.f32 %v2002_v57, %v927_v40 }
 0x1f9   : > { %v973_v44 = vpop.f32.mrf.mxu3 }
 0x1fa   : > { %v974_v45 = vadd.f32 %v973_v44, %v925_v35 }
 0x1fc   : > { %1006 = vst [vmem:[%s2006_s17 + $0x28] sm:$0xff] %v974_v45  ;;  %v929_v36 = vpop.f32.mrf.mxu1 }
 0x1fd   : > { %v930_v56 = vadd.f32 %v2002_v57, %v929_v36 }
 0x201   : > { %v976_v48 = vpop.f32.mrf.mxu3 }
 0x202   : > { %v977_v52 = vadd.f32 %v976_v48, %v928_v46 }
 0x204   : > { %1007 = vst [vmem:[%s2006_s17 + $0x30] sm:$0xff] %v977_v52  ;;  %v932_v54 = vpop.f32.mrf.mxu1 }
 0x205   : > { %v933_v60 = vadd.f32 %v2002_v57, %v932_v54 }
 0x209   : > { %v978_v59 = vpop.f32.mrf.mxu3 }
 0x20a   : > { %v979_v39 = vadd.f32 %v978_v59, %v930_v56 }
 0x20c   : > { %1008 = vst [vmem:[%s2006_s17 + $0x38] sm:$0xff] %v979_v39  ;;  %v934_v41 = vpop.f32.mrf.mxu1 }
 0x20d   : > { %v935_v1 = vadd.f32 %v2002_v57, %v934_v41 }
 0x211   : > { %v981_v61 = vpop.f32.mrf.mxu3 }
 0x212   : > { %v982_v62 = vadd.f32 %v981_v61, %v933_v60 }
 0x214   : > { %1009 = vst [vmem:[%s2006_s17 + $0x40] sm:$0xff] %v982_v62  ;;  %v937_v63 = vpop.f32.mrf.mxu1 }
 0x215   : > { %v938_v6 = vadd.f32 %v2002_v57, %v937_v63 }
 0x219   : > { %v983_v3 = vpop.f32.mrf.mxu3 }
 0x21a   : > { %v984_v5 = vadd.f32 %v983_v3, %v935_v1 }
 0x21c   : > { %1010 = vst [vmem:[%s2006_s17 + $0x48] sm:$0xff] %v984_v5  ;;  %v939_v42 = vpop.f32.mrf.mxu1 }
 0x21d   : > { %v940_v9 = vadd.f32 %v2002_v57, %v939_v42 }
 0x221   : > { %v986_v43 = vpop.f32.mrf.mxu3 }
 0x222   : > { %v987_v7 = vadd.f32 %v986_v43, %v938_v6 }
 0x224   : > { %1011 = vst [vmem:[%s2006_s17 + $0x50] sm:$0xff] %v987_v7  ;;  %v942_v8 = vpop.f32.mrf.mxu1 }
 0x225   : > { %v943_v12 = vadd.f32 %v2002_v57, %v942_v8 }
 0x229   : > { %v988_v10 = vpop.f32.mrf.mxu3 }
 0x22a   : > { %v989_v11 = vadd.f32 %v988_v10, %v940_v9 }
 0x22c   : > { %1012 = vst [vmem:[%s2006_s17 + $0x58] sm:$0xff] %v989_v11  ;;  %v944_v47 = vpop.f32.mrf.mxu1 }
 0x22d   : > { %v945_v14 = vadd.f32 %v2002_v57, %v944_v47 }
 0x231   : > { %v991_v49 = vpop.f32.mrf.mxu3 }
 0x232   : > { %v992_v13 = vadd.f32 %v991_v49, %v943_v12 }
 0x234   : > { %1013 = vst [vmem:[%s2006_s17 + $0x60] sm:$0xff] %v992_v13  ;;  %v947_v20 = vpop.f32.mrf.mxu1 }
 0x235   : > { %v948_v21 = vadd.f32 %v2002_v57, %v947_v20 }
 0x239   : > { %v993_v18 = vpop.f32.mrf.mxu3 }
 0x23a   : > { %v994_v19 = vadd.f32 %v993_v18, %v945_v14 }
 0x23c   : > { %1014 = vst [vmem:[%s2006_s17 + $0x68] sm:$0xff] %v994_v19  ;;  %v949_v51 = vpop.f32.mrf.mxu1 }
 0x23d   : > { %v950_v24 = vadd.f32 %v2002_v57, %v949_v51 }
 0x241   : > { %v996_v22 = vpop.f32.mrf.mxu3 }
 0x242   : > { %v997_v23 = vadd.f32 %v996_v22, %v948_v21 }
 0x244   : > { %1015 = vst [vmem:[%s2006_s17 + $0x70] sm:$0xff] %v997_v23 }
 0x248   : > { %1029 = sbr.rel (!%p1630_p5) target bundleno = 621 (0x26d), region = 44 }
 0x249   : > { %v998_v25 = vpop.f32.mrf.mxu3 }
 0x24a   : > { %v999_v53 = vadd.f32 %v998_v25, %v950_v24 }
 0x24c   : > { %1016 = vst [vmem:[%s2006_s17 + $0x78] sm:$0xff] %v999_v53 }
 0x24d   : > { %s2174_s20 = smov (!%p1032_p11, %s1031_s20), 16 }
 0x24e   : > { %s1380_s29 = sshll.u32 %s2174_s20, 4 }
 0x24f   : > { %s1036_s9 = ssub.s32 256, %s1380_s29 }
 0x250   : > { %s1037_s10 = sshll.u32 %s1036_s9, 4 }
 0x251   : > { %1038 = vsyncadd %s2153_s18, %s1037_s10  ;;  %p2049_p12 = scmp.ne.s32.totalorder %s1380_s29, 0  ;;  %s1382_s12 = sshll.u32 %s1613_s25, 8 }
 0x252   : > { %s1042_s16 = scalar_lea.hbm %s2151_s5, %s1382_s12  ;;  %s1044_s19 = sshll.u32 %s1856_s28, 4  ;;  %s2058_s19 = int_to_ptr.vmem [resolvable:$true] %s1044_s19 }
 0x253   : > { %s1046_s9 = sshll.u32 %s1042_s16, 4  ;;  %s2154_s10 = sshll.u32 %s2174_s20, 8  ;;  %s2060_s9 = int_to_ptr.hbm [resolvable:$true] %s1046_s9 }
 0x254   : > { %s1433_s18 = sshra.s32 %s2058_s19, 4  ;;  %s1435_s29 = sshrl.u32 %s2154_s10, 4  ;;  %s1434_s18 = int_to_ptr.vmem [resolvable:$true] %s1433_s18 }
 0x255   : > { %s1440_s0 = scalar_lea.vmem %s1434_s18, %s1435_s29  ;;  %s1551_s1 = smov [#allocation2]  }
 0x256   : > { %p1441_p13 = scmp.ne.s32.totalorder %s1434_s18, %s1440_s0  ;;  %s1444_s13 = scalar_lea.vmem %s1551_s1, 512 }
 0x257   : > { %p1446_p2 = scmp.lt.s32.totalorder %s1444_s13, %s1440_s0 }
 0x258   : > { %p1442_p0 = pnand %p1441_p13, %p2049_p12 }
 0x25a   : > { %p1443_p1 = pneg %p1442_p0 }
 0x25c   : > { %p1448_p3 = pnand %p1446_p2, %p1443_p1 }
 0x25e   : > { %1451 = shalt.err (!%p1448_p3)
}
 0x25f   : > { %s1452_s28 = sshra.s32 %s2060_s9, 4  ;;  %s1463_s18 = scalar_lea.hbm %s2151_s5, 608  ;;  %s1453_s28 = int_to_ptr.hbm [resolvable:$true] %s1452_s28 }
 0x260   : > { %s1459_s12 = scalar_lea.hbm %s1453_s28, %s1435_s29  ;;  %p1464_p9 = scmp.lt.s32.totalorder %s1453_s28, %s2151_s5 }
 0x261   : > { %p1460_p4 = scmp.ne.s32.totalorder %s1453_s28, %s1459_s12  ;;  %p1465_p10 = scmp.lt.s32.totalorder %s1463_s18, %s1459_s12 }
 0x263   : > { %p1461_p7 = pnand %p1460_p4, %p2049_p12  ;;  %p1466_p11 = por %p1465_p10, %p1464_p9 }
 0x265   : > { %p1462_p8 = pneg %p1461_p7 }
 0x267   : > { %p1467_p13 = pnand %p1466_p11, %p1462_p8 }
 0x269   : > { %1470 = shalt.err (!%p1467_p13)
}
 0x26a   : > { %s1552_s0 = smov 256   ;;  %s1553_s1 = smov 16  }
 0x26b   : > { %s2164_s29 = scalar_lea.sflag [#allocation3], %s1844_s26  ;;  %s2165_s13 = sshll.u32 %s2174_s20, 8 }
 0x26c   : > { %1052 = dma.vmem_to_hbm [thread:$0]  (%p2049_p12), %s2058_s19, %s2165_s13, %s2060_s9, %s2164_s29, %s1552_s0, %s1552_s0, %s1553_s1  }
 0x26d PF: > { %1055 = sbr.rel (!%p1630_p5) target bundleno = 658 (0x292), region = 48  ;;  %s1057_s2 = ssub.s32 (%p1630_p5), 38, %s1695_s15 }
 0x26e   : > { %p1058_p0 = scmp.lt.s32.totalorder (%p1630_p5), %s1057_s2, 16  ;;  %s2166_s14 = scalar_lea.sflag (%p1630_p5), [#allocation5], %s1844_s26 }
 0x272   : > { %s2176_s2 = smov (!%p1058_p0, %s1057_s2), 16 }
 0x273   : > { %s1338_s10 = sshll.u32 %s2176_s2, 3 }
 0x274   : > { %s1061_s28 = ssub.s32 128, %s1338_s10 }
 0x275   : > { %s1062_s12 = sshll.u32 %s1061_s28, 4 }
 0x276   : > { %1063 = vsyncadd %s2166_s14, %s1062_s12  ;;  %p2093_p12 = scmp.ne.s32.totalorder %s1338_s10, 0  ;;  %s1383_s7 = sshll.u32 %s1613_s25, 7 }
 0x277   : > { %s1066_s11 = scalar_lea.hbm %s2152_s6, %s1383_s7  ;;  %s1068_s9 = sshll.u32 %s2006_s17, 4  ;;  %s2102_s9 = int_to_ptr.vmem [resolvable:$true] %s1068_s9 }
 0x278   : > { %s1070_s16 = sshll.u32 %s1066_s11, 4  ;;  %s1342_s18 = sshll.u32 %s2176_s2, 7  ;;  %s2104_s16 = int_to_ptr.hbm [resolvable:$true] %s1070_s16 }
 0x279   : > { %s1472_s0 = sshra.s32 %s2102_s9, 4  ;;  %s1474_s1 = sshrl.u32 %s1342_s18, 4  ;;  %s1473_s0 = int_to_ptr.vmem [resolvable:$true] %s1472_s0 }
 0x27a   : > { %s1479_s29 = scalar_lea.vmem %s1473_s0, %s1474_s1  ;;  %s1554_s25 = smov [#allocation4]  }
 0x27b   : > { %p1480_p5 = scmp.ne.s32.totalorder %s1473_s0, %s1479_s29  ;;  %s1483_s13 = scalar_lea.vmem %s1554_s25, 256 }
 0x27c   : > { %p1485_p3 = scmp.lt.s32.totalorder %s1483_s13, %s1479_s29 }
 0x27d   : > { %p1481_p1 = pnand %p1480_p5, %p2093_p12 }
 0x27f   : > { %p1482_p2 = pneg %p1481_p1 }
 0x281   : > { %p1487_p4 = pnand %p1485_p3, %p1482_p2 }
 0x283   : > { %1490 = shalt.err (!%p1487_p4)
}
 0x284   : > { %s1491_s17 = sshra.s32 %s2104_s16, 4  ;;  %s1502_s14 = scalar_lea.hbm %s2152_s6, 304  ;;  %s1492_s17 = int_to_ptr.hbm [resolvable:$true] %s1491_s17 }
 0x285   : > { %s1498_s10 = scalar_lea.hbm %s1492_s17, %s1474_s1  ;;  %p1503_p10 = scmp.lt.s32.totalorder %s1492_s17, %s2152_s6 }
 0x286   : > { %p1499_p7 = scmp.ne.s32.totalorder %s1492_s17, %s1498_s10  ;;  %p1504_p11 = scmp.lt.s32.totalorder %s1502_s14, %s1498_s10 }
 0x288   : > { %p1500_p8 = pnand %p1499_p7, %p2093_p12  ;;  %p1505_p13 = por %p1504_p11, %p1503_p10 }
 0x28a   : > { %p1501_p9 = pneg %p1500_p8 }
 0x28c   : > { %p1506_p0 = pnand %p1505_p13, %p1501_p9 }
 0x28e   : > { %1509 = shalt.err (!%p1506_p0)
}
 0x28f   : > { %s1555_s20 = smov 128   ;;  %s1556_s11 = smov 8  }
 0x290   : > { %s2168_s0 = scalar_lea.sflag [#allocation5], %s1844_s26 }
 0x291   : > { %1076 = dma.vmem_to_hbm [thread:$0]  (%p2093_p12), %s2102_s9, %s1342_s18, %s2104_s16, %s2168_s0, %s1555_s20, %s1555_s20, %s1556_s11  }
 0x292 PF: > { %p1395_p5 = scmp.ge.s32.totalorder %s1549_s24, 2  ;;  %s1085_s1 = sand.u32 1, %s1537_s21  }
 0x293   : > { %s1086_s29 = scalar_lea.sflag [#allocation3], %s1085_s1 }
 0x294   : > { %p1389_p1 = pnand %p1395_p5, %p1634_p6 }
 0x296   : > { %p1390_p2 = pneg %p1389_p1 }
 0x298   : > { %1528 = dma.done.wait (%p1390_p2), %s1086_s29, 4096  }
 0x299   : > { %1530 = vsyncadd (%p1390_p2), %s1086_s29, 4294963200  ;;  %s1096_s25 = scalar_lea.sflag [#allocation5], %s1085_s1 }
 0x29a   : > { %1532 = dma.done.wait (%p1390_p2), %s1096_s25, 2048  }
 0x29b   : > { %1534 = vsyncadd (%p1390_p2), %s1096_s25, 4294965248  ;;  %p20_p12 = scmp.ge.s32.totalorder %s1617_s27, 5   ;;  %s2169_s21 = smov %s1541_s22 }
 0x29c   : > { %s2170_s22 = smov %s1545_s23  ;;  %s2171_s23 = smov %s1628_s30 }
 0x29d   : > { %s2172_s24 = smov %s1617_s27  ;;  %22 = sbr.rel (!%p20_p12) target bundleno = 9 (0x9), region = 92 }
 0x2a2   :  { %1102 = vsyncpa [#allocation3], 1 }
 0x2a3   :  { %1104 = vsyncpa [#allocation3 + $0x1], 1 }
 0x2a4   :  { %1105 = vsyncpa [#allocation5], 1 }
 0x2a5   :  { %1107 = vsyncpa [#allocation5 + $0x1], 1 }

</bundles_post_ra>
